<compile_context>
chip_gen: v7x
topology: tpu7x:2x2x1
jax: 0.10.0
libtpu: 0.0.40
codegen_flags: <defaults>
</compile_context>

<pallas_src>
import functools

import jax
import jax.numpy as jnp
from jax import lax
from jax.experimental import pallas as pl
from jax.experimental.pallas import tpu as pltpu


def _ffn_kernel(x_ref, w1_ref, b1_ref, w2_ref, b2_ref, o_ref, acc_ref):
    k = pl.program_id(1)

    @pl.when(k == 0)
    def _init():
        # Fuse the second bias into the accumulator init (f32).
        acc_ref[...] = jnp.broadcast_to(
            b2_ref[...].astype(jnp.float32), acc_ref.shape)

    x = x_ref[...]                                              # [tm, dim]
    # First matmul: partial over this hidden chunk.
    h = jnp.dot(x, w1_ref[...],
                preferred_element_type=jnp.float32)             # [tm, th] f32
    h = h + b1_ref[...].astype(jnp.float32)                     # broadcast [1, th]

    # Exact erf GELU (torch.nn.GELU() default).
    inv_sqrt2 = jnp.float32(0.7071067811865476)
    g = 0.5 * h * (1.0 + lax.erf(h * inv_sqrt2))                # [tm, th] f32

    # Second matmul: accumulate this hidden chunk's contribution in f32.
    # NOTE: casting g to the weight dtype is exact for f32; for bf16 weights it
    # deviates slightly from an all-f32 reference (standard mixed precision).
    acc_ref[...] += jnp.dot(g.astype(w2_ref.dtype), w2_ref[...],
                            preferred_element_type=jnp.float32)  # [tm, dim]

    @pl.when(k == pl.num_programs(1) - 1)
    def _finalize():
        o_ref[...] = acc_ref[...].astype(o_ref.dtype)


def _pick_hidden_tile(hidden, target):
    """Largest hidden-chunk size <= target that divides `hidden` evenly.

    Dividing evenly is required for correctness: a padded partial hidden block
    would feed garbage W1/W2 values into the accumulator. Prefer multiples of
    128 (lane width); fall back to the full hidden dim (resident) otherwise.
    """
    if hidden <= target:
        return hidden
    t = (target // 128) * 128
    while t >= 128:
        if hidden % t == 0:
            return t
        t -= 128
    return hidden


@functools.partial(jax.jit, static_argnames=("block_m", "block_h"))
def feed_forward(x, w1, b1, w2, b2, *, block_m=256, block_h=512):
    """x: (..., dim). w1: (dim, hidden), b1: (hidden,), w2: (hidden, dim), b2: (dim,)."""
    orig_shape = x.shape
    dim = orig_shape[-1]
    hidden = w1.shape[1]
    x2d = x.reshape(-1, dim)
    m = x2d.shape[0]

    tm = min(block_m, m)
    th = _pick_hidden_tile(hidden, block_h)
    grid = (pl.cdiv(m, tm), hidden // th)

    b1_2d = b1.reshape(1, hidden)
    b2_2d = b2.reshape(1, dim)

    dbytes = jnp.dtype(x.dtype).itemsize
    cost = pl.CostEstimate(
        flops=4 * m * hidden * dim,                 # two matmuls
        transcendentals=m * hidden,                 # erf per hidden activation
        bytes_accessed=(x2d.size + w1.size + b1.size + w2.size + b2.size) * dbytes
        + m * dim * dbytes,
    )

    out = pl.pallas_call(
        _ffn_kernel,
        out_shape=jax.ShapeDtypeStruct((m, dim), x.dtype),
        grid_spec=pltpu.PrefetchScalarGridSpec(
            num_scalar_prefetch=0,
            grid=grid,
            in_specs=[
                pl.BlockSpec((tm, dim), lambda i, k: (i, 0)),      # x tile
                pl.BlockSpec((dim, th), lambda i, k: (0, k)),      # W1 column chunk
                pl.BlockSpec((1, th), lambda i, k: (0, k)),        # b1 chunk
                pl.BlockSpec((th, dim), lambda i, k: (k, 0)),      # W2 row chunk
                pl.BlockSpec((1, dim), lambda i, k: (0, 0)),       # b2 (tiny, resident)
            ],
            out_specs=pl.BlockSpec((tm, dim), lambda i, k: (i, 0)),
            scratch_shapes=[pltpu.VMEM((tm, dim), jnp.float32)],   # f32 accumulator
        ),
        compiler_params=pltpu.CompilerParams(
            dimension_semantics=("parallel", "arbitrary"),
            # Raise the scoped VMEM limit above the 16/32 MiB defaults while
            # staying within v7x's 64 MiB physical VMEM.
            vmem_limit_bytes=64 * 1024 * 1024,
        ),
        cost_estimate=cost,
    )(x2d, w1, b1_2d, w2, b2_2d)

    return out.reshape(orig_shape)


def _init_params(key, dim, hidden_dim, dtype=jnp.float32):
    # Deterministic synthetic init (PyTorch-Linear-like uniform ranges).
    k1, k2, k3, k4 = jax.random.split(key, 4)
    bound1 = 1.0 / (dim ** 0.5)
    bound2 = 1.0 / (hidden_dim ** 0.5)
    # Stored already transposed relative to torch (out,in) -> (in,out).
    w1 = jax.random.uniform(k1, (dim, hidden_dim), dtype, -bound1, bound1)
    b1 = jax.random.uniform(k2, (hidden_dim,), dtype, -bound1, bound1)
    w2 = jax.random.uniform(k3, (hidden_dim, dim), dtype, -bound2, bound2)
    b2 = jax.random.uniform(k4, (dim,), dtype, -bound2, bound2)
    return w1, b1, w2, b2


def _reference(x, w1, b1, w2, b2):
    h = x @ w1 + b1
    g = 0.5 * h * (1.0 + lax.erf(h * 0.7071067811865476))
    return g @ w2 + b2


if __name__ == "__main__":
    key = jax.random.PRNGKey(0)
    batch, seq, dim, hidden_dim = 2, 8, 32, 64

    kx, kp = jax.random.split(key)
    x = jax.random.normal(kx, (batch, seq, dim), dtype=jnp.float32)
    w1, b1, w2, b2 = _init_params(kp, dim, hidden_dim)

    out = feed_forward(x, w1, b1, w2, b2)
    out = jax.block_until_ready(out)

    ref = _reference(x, w1, b1, w2, b2)
    assert out.shape == x.shape
    assert jnp.allclose(out, ref, atol=1e-5, rtol=1e-5), "mismatch vs reference"

    # Exercise the hidden-tiled path (multiple hidden chunks + partial M tile).
    dim2, hidden2 = 128, 512
    x2 = jax.random.normal(kx, (3, 7, dim2), dtype=jnp.float32)
    p2 = _init_params(kp, dim2, hidden2)
    out2 = jax.block_until_ready(feed_forward(x2, *p2, block_m=16, block_h=128))
    ref2 = _reference(x2, *p2)
    assert jnp.allclose(out2, ref2, atol=1e-4, rtol=1e-4), "mismatch (tiled path)"

    print("KERNEL_OK")
</pallas_src>

<mosaic_0001>
module attributes {stable_mosaic.version = 11 : i64} {
  func.func @_ffn_kernel(%arg0: i32, %arg1: i32, %arg2: memref<16x32xf32, #tpu.memory_space<vmem>>, %arg3: memref<32x64xf32, #tpu.memory_space<vmem>>, %arg4: memref<1x64xf32, #tpu.memory_space<vmem>>, %arg5: memref<64x32xf32, #tpu.memory_space<vmem>>, %arg6: memref<1x32xf32, #tpu.memory_space<vmem>>, %arg7: memref<16x32xf32, #tpu.memory_space<vmem>>, %arg8: memref<16x32xf32, #tpu.memory_space<vmem>>) attributes {dimension_semantics = [#tpu.dimension_semantics<parallel>, #tpu.dimension_semantics<arbitrary>], iteration_bounds = array<i64: 1, 1>, scalar_prefetch = 0 : i64, scratch_operands = 1 : i64, tpu.core_type = #tpu.core_type<tc>, window_params = [{transform_indices = @transform_0, window_bounds = array<i64: 16, 32>}, {transform_indices = @transform_1, window_bounds = array<i64: 32, 64>}, {transform_indices = @transform_2, window_bounds = array<i64: 1, 64>}, {transform_indices = @transform_3, window_bounds = array<i64: 64, 32>}, {pipeline_mode = #tpu.pipeline_mode<synchronous>, transform_indices = @transform_4, window_bounds = array<i64: 1, 32>}, {transform_indices = @transform_5, window_bounds = array<i64: 16, 32>}]} {
    %c0_i32 = arith.constant 0 : i32
    %0 = arith.cmpi eq, %arg1, %c0_i32 : i32
    %1 = arith.extui %0 : i1 to i32
    %c0_i32_0 = arith.constant 0 : i32
    %2 = arith.cmpi ne, %1, %c0_i32_0 : i32
    scf.if %2 {
      %c0_18 = arith.constant 0 : index
      %c0_19 = arith.constant 0 : index
      %25 = vector.load %arg6[%c0_18, %c0_19] : memref<1x32xf32, #tpu.memory_space<vmem>>, vector<1x32xf32>
      %26 = vector.shape_cast %25 : vector<1x32xf32> to vector<1x32xf32>
      %27 = vector.broadcast %26 : vector<1x32xf32> to vector<16x32xf32>
      %c0_20 = arith.constant 0 : index
      %c0_21 = arith.constant 0 : index
      %28 = vector.load %arg8[%c0_20, %c0_21] : memref<16x32xf32, #tpu.memory_space<vmem>>, vector<16x32xf32>
      tpu.vector_store %arg8[%c0_20, %c0_21], %27 {strides = array<i32>} : memref<16x32xf32, #tpu.memory_space<vmem>>, vector<16x32xf32>,
    } else {
    }
    %c0 = arith.constant 0 : index
    %c0_1 = arith.constant 0 : index
    %3 = vector.load %arg2[%c0, %c0_1] : memref<16x32xf32, #tpu.memory_space<vmem>>, vector<16x32xf32>
    %c0_2 = arith.constant 0 : index
    %c0_3 = arith.constant 0 : index
    %4 = vector.load %arg3[%c0_2, %c0_3] : memref<32x64xf32, #tpu.memory_space<vmem>>, vector<32x64xf32>
    %cst = arith.constant dense<0.000000e+00> : vector<16x64xf32>
    %5 = tpu.matmul %3, %4, %cst {dimension_numbers = #tpu.dot_dimension_numbers<[1], [0], [0], [1], [0, 0, 1, 1], [], []>} : vector<16x32xf32>, vector<32x64xf32>, vector<16x64xf32> -> vector<16x64xf32>
    %c0_4 = arith.constant 0 : index
    %c0_5 = arith.constant 0 : index
    %6 = vector.load %arg4[%c0_4, %c0_5] : memref<1x64xf32, #tpu.memory_space<vmem>>, vector<1x64xf32>
    %7 = vector.broadcast %6 : vector<1x64xf32> to vector<16x64xf32>
    %8 = arith.addf %5, %7 : vector<16x64xf32>
    %cst_6 = arith.constant 5.000000e-01 : f32
    %9 = vector.broadcast %cst_6 : f32 to vector<16x64xf32>
    %10 = arith.mulf %9, %8 : vector<16x64xf32>
    %cst_7 = arith.constant 0.707106769 : f32
    %11 = vector.broadcast %cst_7 : f32 to vector<16x64xf32>
    %12 = arith.mulf %8, %11 : vector<16x64xf32>
    %13 = math.erf %12 : vector<16x64xf32>
    %cst_8 = arith.constant 1.000000e+00 : f32
    %14 = vector.broadcast %cst_8 : f32 to vector<16x64xf32>
    %15 = arith.addf %14, %13 : vector<16x64xf32>
    %16 = arith.mulf %10, %15 : vector<16x64xf32>
    %c0_9 = arith.constant 0 : index
    %c0_10 = arith.constant 0 : index
    %17 = vector.load %arg8[%c0_9, %c0_10] : memref<16x32xf32, #tpu.memory_space<vmem>>, vector<16x32xf32>
    %c0_11 = arith.constant 0 : index
    %c0_12 = arith.constant 0 : index
    %18 = vector.load %arg5[%c0_11, %c0_12] : memref<64x32xf32, #tpu.memory_space<vmem>>, vector<64x32xf32>
    %cst_13 = arith.constant dense<0.000000e+00> : vector<16x32xf32>
    %19 = tpu.matmul %16, %18, %cst_13 {dimension_numbers = #tpu.dot_dimension_numbers<[1], [0], [0], [1], [0, 0, 1, 1], [], []>} : vector<16x64xf32>, vector<64x32xf32>, vector<16x32xf32> -> vector<16x32xf32>
    %20 = arith.addf %17, %19 : vector<16x32xf32>
    %c0_14 = arith.constant 0 : index
    %c0_15 = arith.constant 0 : index
    %21 = vector.load %arg8[%c0_14, %c0_15] : memref<16x32xf32, #tpu.memory_space<vmem>>, vector<16x32xf32>
    tpu.vector_store %arg8[%c0_14, %c0_15], %20 {strides = array<i32>} : memref<16x32xf32, #tpu.memory_space<vmem>>, vector<16x32xf32>,
    %c0_i32_16 = arith.constant 0 : i32
    %22 = arith.cmpi eq, %arg1, %c0_i32_16 : i32
    %23 = arith.extui %22 : i1 to i32
    %c0_i32_17 = arith.constant 0 : i32
    %24 = arith.cmpi ne, %23, %c0_i32_17 : i32
    scf.if %24 {
      %c0_18 = arith.constant 0 : index
      %c0_19 = arith.constant 0 : index
      %25 = vector.load %arg8[%c0_18, %c0_19] : memref<16x32xf32, #tpu.memory_space<vmem>>, vector<16x32xf32>
      %c0_20 = arith.constant 0 : index
      %c0_21 = arith.constant 0 : index
      %26 = vector.load %arg7[%c0_20, %c0_21] : memref<16x32xf32, #tpu.memory_space<vmem>>, vector<16x32xf32>
      tpu.vector_store %arg7[%c0_20, %c0_21], %25 {strides = array<i32>} : memref<16x32xf32, #tpu.memory_space<vmem>>, vector<16x32xf32>,
    } else {
    }
    return
  }
  func.func @transform_0(%arg0: i32, %arg1: i32) -> (i32, i32) {
    %c0_i32 = arith.constant 0 : i32
    %c0_i32_0 = arith.constant 0 : i32
    return %arg0, %c0_i32 : i32, i32
  }
  func.func @transform_1(%arg0: i32, %arg1: i32) -> (i32, i32) {
    %c0_i32 = arith.constant 0 : i32
    %c0_i32_0 = arith.constant 0 : i32
    return %c0_i32, %arg1 : i32, i32
  }
  func.func @transform_2(%arg0: i32, %arg1: i32) -> (i32, i32) {
    %c0_i32 = arith.constant 0 : i32
    %c0_i32_0 = arith.constant 0 : i32
    return %c0_i32, %arg1 : i32, i32
  }
  func.func @transform_3(%arg0: i32, %arg1: i32) -> (i32, i32) {
    %c0_i32 = arith.constant 0 : i32
    %c0_i32_0 = arith.constant 0 : i32
    return %arg1, %c0_i32 : i32, i32
  }
  func.func @transform_4(%arg0: i32, %arg1: i32) -> (i32, i32) {
    %c0_i32 = arith.constant 0 : i32
    %c0_i32_0 = arith.constant 0 : i32
    %c0_i32_1 = arith.constant 0 : i32
    return %c0_i32, %c0_i32_0 : i32, i32
  }
  func.func @transform_5(%arg0: i32, %arg1: i32) -> (i32, i32) {
    %c0_i32 = arith.constant 0 : i32
    %c0_i32_0 = arith.constant 0 : i32
    return %arg0, %c0_i32 : i32, i32
  }
}

</mosaic_0001>

<bundles_post_ra>
// kernel: feed_forward.1
= control target key start
LH: loop header
LB: loop body
LE: loop exit
PB: predicated region body
PF: predicated region fallthrough
CT: control target
= control target key end

     0   :  { %10 = vsyncpa [#allocation4], 0  ;;  %s691_s0 = inlined_call_operand.hbm [shape: f32[16,32], index: 0, kind: input, shape index: {}]   ;;  %s692_s1 = inlined_call_operand.hbm [shape: f32[32,64], index: 1, kind: input, shape index: {}]   ;;  %s693_s2 = inlined_call_operand.hbm [shape: f32[1,64], index: 2, kind: input, shape index: {}]   ;;  %s694_s3 = inlined_call_operand.hbm [shape: f32[64,32], index: 3, kind: input, shape index: {}]   ;;  %s695_s4 = inlined_call_operand.hbm [shape: f32[1,32], index: 4, kind: input, shape index: {}]   ;;  %s696_s5 = inlined_call_operand.hbm [shape: f32[16,32], index: 5, kind: output, shape index: {}]  }
   0x1   :  { %11 = vsyncpa [#allocation7], 0 }
   0x2   :  { %12 = vsyncpa [#allocation10], 0 }
   0x3   :  { %13 = vsyncpa [#allocation5], 0  ;;  %s554_s18 = smov [#allocation6]   ;;  %s555_s20 = smov [#allocation9]  }
   0x4   :  { %s31_s19 = sshll.u32 %s554_s18, 4  ;;  %s53_s21 = sshll.u32 %s555_s20, 4  ;;  %s32_s19 = int_to_ptr.vmem [resolvable:$true] %s31_s19  ;;  %s592_s21 = int_to_ptr.vmem [resolvable:$true] %s53_s21 }
   0x5   :  { %s414_s24 = scalar_lea.hbm %s692_s1, 512 }
   0x6   :  { %p415_p0 = scmp.ne.s32.totalorder %s692_s1, %s414_s24  ;;  %p418_p1 = scmp.lt.u32.totalorder %s414_s24, %s692_s1 }
   0x8   :  { %p420_p2 = pnand %p418_p1, %p415_p0 }
   0xa   :  { %423 = shalt.err (!%p420_p2)
}
   0xb   :  { %s424_s29 = scalar_lea.vmem %s32_s19, 512  ;;  %p429_p4 = scmp.lt.s32.totalorder %s32_s19, %s32_s19 }
   0xc   :  { %p425_p3 = scmp.ne.s32.totalorder %s32_s19, %s424_s29  ;;  %p430_p5 = scmp.lt.s32.totalorder %s424_s29, %s424_s29 }
   0xe   :  { %p431_p6 = por %p430_p5, %p429_p4 }
  0x10   :  { %p432_p7 = pnand %p431_p6, %p425_p3 }
  0x12   :  { %435 = shalt.err (!%p432_p7)
}
  0x13   :  { %s556_s30 = smov 128   ;;  %s557_s6 = smov 8  }
  0x14   :  { %37 = dma.hbm_to_vmem [thread:$0]  %s692_s1, 512, %s32_s19, [#allocation7], %s556_s30, %s556_s30, %s557_s6  }
  0x15   :  { %s436_s11 = scalar_lea.hbm %s694_s3, 1024 }
  0x16   :  { %p437_p8 = scmp.ne.s32.totalorder %s694_s3, %s436_s11  ;;  %p440_p9 = scmp.lt.u32.totalorder %s436_s11, %s694_s3 }
  0x18   :  { %p442_p10 = pnand %p440_p9, %p437_p8 }
  0x1a   :  { %445 = shalt.err (!%p442_p10)
}
  0x1b   :  { %s446_s16 = scalar_lea.vmem %s592_s21, 1024  ;;  %p451_p12 = scmp.lt.s32.totalorder %s592_s21, %s592_s21 }
  0x1c   :  { %p447_p11 = scmp.ne.s32.totalorder %s592_s21, %s446_s16  ;;  %p452_p13 = scmp.lt.s32.totalorder %s446_s16, %s446_s16 }
  0x1e   :  { %p453_p0 = por %p452_p13, %p451_p12 }
  0x20   :  { %p454_p1 = pnand %p453_p0, %p447_p11 }
  0x22   :  { %457 = shalt.err (!%p454_p1)
}
  0x23   :  { %59 = dma.hbm_to_vmem [thread:$0]  %s694_s3, 1024, %s592_s21, [#allocation10], %s556_s30, %s556_s30, %s557_s6  }
  0x24   :  { %s558_s18 = smov [#allocation3]   ;;  %s559_s20 = smov [#allocation8]  }
  0x25   :  { %s19_s19 = sshll.u32 %s558_s18, 4  ;;  %s44_s22 = sshll.u32 %s559_s20, 4  ;;  %s20_s19 = int_to_ptr.vmem [resolvable:$true] %s19_s19  ;;  %s45_s22 = int_to_ptr.vmem [resolvable:$true] %s44_s22 }
  0x26   :  { %s458_s25 = scalar_lea.hbm %s691_s0, 256 }
  0x27   :  { %p459_p2 = scmp.ne.s32.totalorder %s691_s0, %s458_s25  ;;  %p462_p3 = scmp.lt.u32.totalorder %s458_s25, %s691_s0 }
  0x29   :  { %p464_p4 = pnand %p462_p3, %p459_p2 }
  0x2b   :  { %467 = shalt.err (!%p464_p4)
}
  0x2c   :  { %s468_s3 = scalar_lea.vmem %s20_s19, 256  ;;  %p473_p6 = scmp.lt.s32.totalorder %s20_s19, %s20_s19 }
  0x2d   :  { %p469_p5 = scmp.ne.s32.totalorder %s20_s19, %s468_s3  ;;  %p474_p7 = scmp.lt.s32.totalorder %s468_s3, %s468_s3 }
  0x2f   :  { %p475_p8 = por %p474_p7, %p473_p6 }
  0x31   :  { %p476_p9 = pnand %p475_p8, %p469_p5 }
  0x33   :  { %479 = shalt.err (!%p476_p9)
}
  0x34   :  { %25 = dma.hbm_to_vmem [thread:$0]  %s691_s0, 256, %s20_s19, [#allocation4], %s556_s30, %s556_s30, %s557_s6  }
  0x35   :  { %s480_s10 = scalar_lea.hbm %s693_s2, 16 }
  0x36   :  { %p481_p10 = scmp.ne.s32.totalorder %s693_s2, %s480_s10  ;;  %p484_p11 = scmp.lt.u32.totalorder %s480_s10, %s693_s2 }
  0x38   :  { %p486_p12 = pnand %p484_p11, %p481_p10 }
  0x3a   :  { %489 = shalt.err (!%p486_p12)
}
  0x3b   :  { %s490_s15 = scalar_lea.vmem %s45_s22, 16  ;;  %s494_s16 = scalar_lea.vmem %s45_s22, 32 }
  0x3c   :  { %p491_p13 = scmp.ne.s32.totalorder %s45_s22, %s490_s15  ;;  %p495_p0 = scmp.lt.s32.totalorder %s45_s22, %s45_s22 }
  0x3d   :  { %p496_p1 = scmp.lt.s32.totalorder %s494_s16, %s490_s15 }
  0x3f   :  { %p497_p2 = por %p496_p1, %p495_p0 }
  0x41   :  { %p498_p3 = pnand %p497_p2, %p491_p13 }
  0x43   :  { %501 = shalt.err (!%p498_p3)
}
  0x44   :  { %47 = dma.hbm_to_vmem [thread:$0]  %s693_s2, 16, %s45_s22, [#allocation7]  }
  0x45   :  { %s560_s17 = smov [#allocation11]   ;;  %s502_s23 = scalar_lea.hbm %s695_s4, 16 }
  0x46   :  { %s66_s18 = sshll.u32 %s560_s17, 4  ;;  %p503_p4 = scmp.ne.s32.totalorder %s695_s4, %s502_s23  ;;  %s67_s18 = int_to_ptr.vmem [resolvable:$true] %s66_s18 }
  0x47   :  { %p506_p5 = scmp.lt.u32.totalorder %s502_s23, %s695_s4 }
  0x49   :  { %p508_p6 = pnand %p506_p5, %p503_p4 }
  0x4b   :  { %511 = shalt.err (!%p508_p6)
}
  0x4c   :  { %s512_s28 = scalar_lea.vmem %s67_s18, 16  ;;  %s516_s2 = scalar_lea.vmem %s67_s18, 32 }
  0x4d   :  { %p513_p7 = scmp.ne.s32.totalorder %s67_s18, %s512_s28  ;;  %p517_p8 = scmp.lt.s32.totalorder %s67_s18, %s67_s18 }
  0x4e   :  { %p518_p9 = scmp.lt.s32.totalorder %s516_s2, %s512_s28 }
  0x50   :  { %p519_p10 = por %p518_p9, %p517_p8 }
  0x52   :  { %p520_p11 = pnand %p519_p10, %p513_p7 }
  0x54   :  { %523 = shalt.err (!%p520_p11)
}
  0x55   :  { %69 = dma.hbm_to_vmem [thread:$0]  %s695_s4, 16, %s67_s18, [#allocation10]  }
  0x56   :  { %546 = dma.done.wait [#allocation4], 256  }
  0x57   :  { %547 = vsyncadd [#allocation4], 4294967040 }
  0x58   :  { %548 = dma.done.wait [#allocation7], 528  }
  0x59   :  { %549 = vsyncadd [#allocation7], 4294966768 }
  0x5a   :  { %550 = dma.done.wait [#allocation10], 1040  }
  0x5b   :  { %551 = vsyncadd [#allocation10], 4294966256  ;;  %vm96_vm0 = vcmask 261120   ;;  %v101_v0 = vld [vmem:[#allocation6] sm:$0xff]  ;;  %v102_v1 = vld [vmem:[#allocation6 + $0x8] sm:$0xff]  ;;  %vm214_vm1 = vcmask 523264  }
  0x5c   :  { %v103_v2 = vld [vmem:[#allocation6 + $0x10] sm:$0xff]  ;;  %v378_v3 = vpack.c.bf16 %v102_v1, %v101_v0  ;;  %v104_v4 = vld [vmem:[#allocation6 + $0x18] sm:$0xff]  ;;  %v206_v8 = vld [vmem:[#allocation9] sm:$0xff]  ;;  %s561_s4 = smov [#allocation12]  }
  0x5d   :  { %v99_v5 = vld [vmem:[#allocation3] sm:$0xff]  ;;  %v382_v6 = vpack.c.bf16 %v104_v4, %v103_v2  ;;  %v100_v7 = vld [vmem:[#allocation3 + $0x8] sm:$0xff]  ;;  %v210_v14 = vld [vmem:[#allocation9 + $0x20] sm:$0xff]  ;;  %s312_s3 = sshll.u32 %s561_s4, 4  ;;  %s313_s3 = int_to_ptr.vmem [resolvable:$true] %s312_s3 }
  0x5e   :  { %356 = vmatprep.mubr.msk.f32.mxu0 %vm96_vm0, %v99_v5  ;;  %379 = vmatprep.subr.bf16.mxu0 %v378_v3  ;;  %v207_v9 = vld [vmem:[#allocation9 + $0x8] sm:$0xff]  ;;  %v208_v11 = vld [vmem:[#allocation9 + $0x10] sm:$0xff]  ;;  %v209_v12 = vld [vmem:[#allocation9 + $0x18] sm:$0xff]  ;;  %s524_s21 = scalar_lea.vmem %s313_s3, 256  ;;  %p529_p13 = scmp.lt.s32.totalorder %s313_s3, %s313_s3 }
  0x5f   :  { %381 = vmatpush3.bf16.msra.mxu0 %v378_v3  ;;  %v386_v10 = vpack.c.bf16 %v207_v9, %v206_v8  ;;  %v390_v13 = vpack.c.bf16 %v209_v12, %v208_v11  ;;  %v211_v15 = vld [vmem:[#allocation9 + $0x28] sm:$0xff]  ;;  %v212_v17 = vld [vmem:[#allocation9 + $0x30] sm:$0xff]  ;;  %v213_v18 = vld [vmem:[#allocation9 + $0x38] sm:$0xff]  ;;  %p525_p12 = scmp.ne.s32.totalorder %s313_s3, %s524_s21  ;;  %p530_p0 = scmp.lt.s32.totalorder %s524_s21, %s524_s21 }
  0x60   :  { %383 = vmatprep.subr.bf16.mxu0 %v382_v6  ;;  %v394_v16 = vpack.c.bf16 %v211_v15, %v210_v14  ;;  %v398_v19 = vpack.c.bf16 %v213_v18, %v212_v17  ;;  %v326_v20 = vld [vmem:[#allocation11] ss:$0 sm:$0xff]  ;;  %v327_v21 = vld [vmem:[#allocation8] ss:$0 sm:$0xff] }
  0x61   :  { %387 = vmatprep.subr.bf16.mxu1 %v386_v10  ;;  %98 = vst.msk [vmem:[#allocation2 + $0x8] sm:$0xff] %vm96_vm0, %v326_v20  ;;  %97 = vst.msk [vmem:[#allocation2] sm:$0xff] %vm96_vm0, %v326_v20  ;;  %p531_p1 = por %p530_p0, %p529_p13 }
  0x62   :  { %389 = vmatpush3.bf16.msra.mxu1 %v386_v10 }
  0x63   :  { %385 = vmatpush3.bf16.msra.mxu0 %v382_v6  ;;  %391 = vmatprep.subr.bf16.mxu1 %v390_v13  ;;  %p532_p2 = pnand %p531_p1, %p525_p12 }
  0x66   :  { %357 = vmatmul.mubr.msk.f32.vlgmr.msra.gmra.mrb[0].mxu0 %vm96_vm0, %v100_v7  ;;  %393 = vmatpush3.bf16.msra.mxu1 %v390_v13 }
  0x67   :  { %395 = vmatprep.subr.bf16.mxu1 %v394_v16 }
  0x68   :  { %v205_v36 = vld [vmem:[#allocation2 + $0x8] sm:$0xff]  ;;  %v204_v37 = vld [vmem:[#allocation2] sm:$0xff] }
  0x6a   :  { %397 = vmatpush3.bf16.msra.mxu1 %v394_v16 }
  0x6b   :  { %399 = vmatprep.subr.bf16.mxu1 %v398_v19 }
  0x6e   :  { %401 = vmatpush3.bf16.msra.mxu1 %v398_v19 }
 0x139   :  { %v358_v22 = vpop.f32.mrb[0].mxu0 }
 0x13a   :  { %v191_v23 = vadd.f32 %v358_v22, %v327_v21  ;;  %v185_v24 = vpop.f32.mrb[1].mxu0 }
 0x13b   :  { %v186_v25 = vadd.f32 %v327_v21, %v185_v24 }
 0x13c   :  { %v197_v26 = vmul.f32 0.70710677, %v191_v23  ;;  %v195_v33 = vmul.f32 0.5, %v191_v23 }
 0x13d   :  { %v196_v27 = vmul.f32 0.70710677, %v186_v25  ;;  %v194_v31 = vmul.f32 0.5, %v186_v25 }
 0x13e   :  { %410 = verf.f32 %v197_v26 }
 0x13f   :  { %412 = verf.f32 %v196_v27 }
 0x148   :  { %v411_v28 = vpop.eup %410 }
 0x149   :  { %v413_v29 = vpop.eup %412  ;;  %v201_v30 = vadd.f32 1.0, %v411_v28 }
 0x14a   :  { %v200_v32 = vadd.f32 1.0, %v413_v29 }
 0x14b   :  { %v203_v35 = vmul.f32 %v201_v30, %v195_v33 }
 0x14c   :  { %v202_v34 = vmul.f32 %v200_v32, %v194_v31 }
 0x14e   :  { %375 = vmatprep.mubr.msk.f32.mxu1 %vm214_vm1, %v202_v34 }
 0x14f   :  { %376 = vmatmul.mubr.msk.f32.vlgmr.msra.gmra.mrb[0].mxu1 %vm214_vm1, %v203_v35 }
 0x222   :  { %v377_v38 = vpop.f32.mrb[0].mxu1 }
 0x223   :  { %v297_v39 = vadd.f32 %v377_v38, %v205_v36  ;;  %v287_v40 = vpop.f32.mrb[1].mxu1 }
 0x224   :  { %v296_v41 = vadd.f32 %v287_v40, %v204_v37 }
 0x225   :  { %299 = vst.msk [vmem:[#allocation2 + $0x8] sm:$0xff] %vm96_vm0, %v297_v39 }
 0x226   :  { %298 = vst.msk [vmem:[#allocation2] sm:$0xff] %vm96_vm0, %v296_v41 }
 0x22c   :  { %v304_v42 = vld [vmem:[#allocation2 + $0x8] sm:$0xff] }
 0x22d   :  { %v303_v43 = vld [vmem:[#allocation2] sm:$0xff]  ;;  %306 = vst.msk [vmem:[#allocation12 + $0x8] sm:$0xff] %vm96_vm0, %v304_v42 }
 0x22e   :  { %305 = vst.msk [vmem:[#allocation12] sm:$0xff] %vm96_vm0, %v303_v43 }
 0x22f   :  { %535 = shalt.err (!%p532_p2)
}
 0x230   :  { %s536_s9 = scalar_lea.hbm %s696_s5, 256 }
 0x231   :  { %p537_p3 = scmp.ne.s32.totalorder %s696_s5, %s536_s9  ;;  %p540_p4 = scmp.lt.u32.totalorder %s536_s9, %s696_s5 }
 0x233   :  { %p542_p5 = pnand %p540_p4, %p537_p3 }
 0x235   :  { %545 = shalt.err (!%p542_p5)
}
 0x236   :  { %318 = dma.vmem_to_hbm [thread:$0]  %s313_s3, 256, %s696_s5, [#allocation5], %s556_s30, %s556_s30, %s557_s6  }
 0x237   :  { %552 = dma.done.wait [#allocation5], 256  }
 0x238   :  { %553 = vsyncadd [#allocation5], 4294967040 }
 0x239   :  { %322 = vsyncpa [#allocation4], 1 }
 0x23a   :  { %323 = vsyncpa [#allocation7], 1 }
 0x23b   :  { %324 = vsyncpa [#allocation10], 1 }
 0x23c   :  { %325 = vsyncpa [#allocation5], 1 }

</bundles_post_ra>
